<compile_context>
chip_gen: v6e
topology: v6e:2x2x1
jax: 0.10.0
libtpu: 0.0.40
codegen_flags: <defaults>
</compile_context>

<pallas_src>
import jax
import jax.numpy as jnp
from jax.experimental import pallas as pl
from jax.experimental.pallas import tpu as pltpu


def _round_up(x, m):
    return ((x + m - 1) // m) * m


def _cdiv(a, b):
    return -(-a // b)


def _deeponet_kernel(xt_ref, wt1_ref, bt1_ref, weff_ref, c_ref, out_ref):
    # xt_ref  : (1, n_trunk, TILE_Q)   lane-dense trunk tile (Q on lanes)
    # wt1_ref : (hidden_t, n_trunk)    grid-invariant, VMEM-resident
    # bt1_ref : (hidden_t, 1)          f32 bias column
    # weff_ref: (1, 1, hidden_t)       per-batch fused branch vector
    # c_ref   : (1, 1, 1)              per-batch scalar (branch.bt2 + bias)
    # out_ref : (1, 1, TILE_Q)         lane-dense output row tile
    xt = xt_ref[0]                                                   # (n_trunk, TILE_Q)
    # trunk layer 1: (hidden_t, n_trunk) @ (n_trunk, TILE_Q) -> (hidden_t, TILE_Q)
    ht = jnp.maximum(
        jnp.dot(wt1_ref[...], xt, preferred_element_type=jnp.float32)
        + bt1_ref[...],
        0.0)
    w_eff = weff_ref[0]                                              # (1, hidden_t)
    # Fused trunk-layer-2 + branch contraction.  M=1 MXU matvec; acceptable while the
    # kernel is HBM/step-overhead bound -- move to VPU+XLU only if MXU saturates.
    row = jnp.dot(w_eff, ht.astype(w_eff.dtype),
                  preferred_element_type=jnp.float32) + c_ref[0]     # (1, TILE_Q)
    out_ref[...] = row[None].astype(out_ref.dtype)                   # (1, 1, TILE_Q)


def deeponet_forward(x_branch, x_trunk, params, *, tile_q=4096,
                     mxu_dtype=jnp.bfloat16):
    """x_branch: (B, n_branch) f32; x_trunk: (B, Q, n_trunk) or (B, n_trunk) f32.

    Returns (B, Q, 1) float32, matching the PyTorch module.
    mxu_dtype=bfloat16 feeds bf16 operands to the MXU (f32 accumulation, f32 biases);
    pass mxu_dtype=None for bit-close f32 output.
    """
    if x_trunk.ndim == 2:
        x_trunk = x_trunk[:, None, :]
    B, _ = x_branch.shape
    _, Q, n_trunk = x_trunk.shape
    (wb1, bb1, wb2, bb2, wt1, bt1, wt2, bt2, bias) = params
    hidden_t = wt1.shape[0]

    # ---- branch MLP + algebraic fusion, hoisted to plain XLA (always f32) ----
    xb = x_branch.astype(jnp.float32)
    hb = jnp.maximum(xb @ wb1.T + bb1, 0.0)                  # (B, hidden_b)
    branch = hb @ wb2.T + bb2                                # (B, n_inter)
    w_eff = branch @ wt2                                     # (B, hidden_t)
    c = branch @ bt2 + bias[0]                               # (B,)

    # ---- lane-aligned, balanced Q tiling (padding <= TILE_Q - 1 rows) ----
    LANE = 128
    q_lane = _round_up(max(Q, 1), LANE)
    tile_req = max(_round_up(tile_q, LANE), LANE)
    num_qt = max(_cdiv(q_lane, tile_req), 1)
    TILE_Q = _round_up(_cdiv(q_lane, num_qt), LANE)
    Q_pad = num_qt * TILE_Q

    xt = x_trunk
    if Q_pad != Q:
        xt = jnp.pad(xt, ((0, 0), (0, Q_pad - Q), (0, 0)))
    # (B, Q_pad, n_trunk) -> (B, n_trunk, Q_pad): lane-dense trunk tiles in the kernel.
    xt_t = jnp.transpose(xt, (0, 2, 1))

    compute_dtype = jnp.float32 if mxu_dtype is None else mxu_dtype
    xt_t = xt_t.astype(compute_dtype)
    wt1_c = wt1.astype(compute_dtype)                        # (hidden_t, n_trunk)
    weff_c = w_eff[:, None, :].astype(compute_dtype)         # (B, 1, hidden_t)
    bt1_col = bt1.astype(jnp.float32)[:, None]               # (hidden_t, 1)
    c_c = c.astype(jnp.float32)[:, None, None]               # (B, 1, 1)

    out = pl.pallas_call(
        _deeponet_kernel,
        out_shape=jax.ShapeDtypeStruct((B, 1, Q_pad), jnp.float32),
        grid=(B, num_qt),
        in_specs=[
            pl.BlockSpec((1, n_trunk, TILE_Q), lambda b, qt: (b, 0, qt)),  # trunk tile
            pl.BlockSpec((hidden_t, n_trunk), lambda b, qt: (0, 0)),       # wt1 (resident)
            pl.BlockSpec((hidden_t, 1), lambda b, qt: (0, 0)),             # bt1 column
            pl.BlockSpec((1, 1, hidden_t), lambda b, qt: (b, 0, 0)),       # W_eff[b]
            pl.BlockSpec((1, 1, 1), lambda b, qt: (b, 0, 0)),              # c[b]
        ],
        out_specs=pl.BlockSpec((1, 1, TILE_Q), lambda b, qt: (b, 0, qt)),
        compiler_params=pltpu.CompilerParams(
            # No scratch-carried deps -> both axes parallel (2 TCs on v7x).
            dimension_semantics=("parallel", "parallel"),
            vmem_limit_bytes=32 * 1024 * 1024,
        ),
    )(xt_t, wt1_c, bt1_col, weff_c, c_c)

    # (B, 1, Q_pad) lane-dense slab -> (B, Q, 1) PyTorch layout
    return out[:, 0, :Q][..., None]


def reference_forward(x_branch, x_trunk, params):
    (wb1, bb1, wb2, bb2, wt1, bt1, wt2, bt2, bias) = params
    if x_trunk.ndim == 2:
        x_trunk = x_trunk[:, None, :]
    hb = jnp.maximum(x_branch @ wb1.T + bb1, 0.0)
    branch = hb @ wb2.T + bb2                                 # (B, I)
    ht = jnp.maximum(x_trunk @ wt1.T + bt1, 0.0)
    trunk = ht @ wt2.T + bt2                                  # (B, Q, I)
    out = jnp.einsum('bqi,bi->bq', trunk, branch)[..., None] + bias[0]
    return out


def init_params(key, n_branch, n_trunk, hidden_b, hidden_t, n_inter):
    ks = jax.random.split(key, 9)
    s = 0.1
    wb1 = s * jax.random.normal(ks[0], (hidden_b, n_branch), jnp.float32)
    bb1 = s * jax.random.normal(ks[1], (hidden_b,), jnp.float32)
    wb2 = s * jax.random.normal(ks[2], (n_inter, hidden_b), jnp.float32)
    bb2 = s * jax.random.normal(ks[3], (n_inter,), jnp.float32)
    wt1 = s * jax.random.normal(ks[4], (hidden_t, n_trunk), jnp.float32)
    bt1 = s * jax.random.normal(ks[5], (hidden_t,), jnp.float32)
    wt2 = s * jax.random.normal(ks[6], (n_inter, hidden_t), jnp.float32)
    bt2 = s * jax.random.normal(ks[7], (n_inter,), jnp.float32)
    bias = jax.random.normal(ks[8], (1,), jnp.float32)
    return (wb1, bb1, wb2, bb2, wt1, bt1, wt2, bt2, bias)


if __name__ == "__main__":
    key = jax.random.PRNGKey(0)
    k_xb, k_xt, k_p, k2_xb, k2_xt, k2_p = jax.random.split(key, 6)

    # --- check 1: small DeepONet-consistent shapes (single row tile), exact f32 ---
    B, Q = 2, 8
    n_branch, n_trunk = 16, 8
    hidden_b, hidden_t, n_inter = 32, 32, 32
    x_branch = jax.random.normal(k_xb, (B, n_branch), jnp.float32)
    x_trunk = jax.random.normal(k_xt, (B, Q, n_trunk), jnp.float32)
    params = init_params(k_p, n_branch, n_trunk, hidden_b, hidden_t, n_inter)

    out = jax.block_until_ready(deeponet_forward(x_branch, x_trunk, params,
                                                 mxu_dtype=None))
    ref = reference_forward(x_branch, x_trunk, params)
    assert out.shape == (B, Q, 1), out.shape
    assert jnp.allclose(out, ref, atol=2e-5, rtol=1e-5), "mismatch vs reference (small)"

    # --- check 2: multi-tile grid (Q padding + multiple q tiles per batch), exact f32 ---
    B2, Q2 = 3, 700
    nb2, nt2, hb2, ht2, ni2 = 24, 4, 64, 64, 48
    xb2 = jax.random.normal(k2_xb, (B2, nb2), jnp.float32)
    xt2 = jax.random.normal(k2_xt, (B2, Q2, nt2), jnp.float32)
    params2 = init_params(k2_p, nb2, nt2, hb2, ht2, ni2)

    out2 = jax.block_until_ready(deeponet_forward(xb2, xt2, params2,
                                                  tile_q=256, mxu_dtype=None))
    ref2 = reference_forward(xb2, xt2, params2)
    assert out2.shape == (B2, Q2, 1), out2.shape
    assert jnp.allclose(out2, ref2, atol=2e-5, rtol=1e-5), "mismatch vs reference (tiled)"

    # --- check 3: default bf16 MXU-operand path (f32 accumulation), loose tolerance ---
    out3 = jax.block_until_ready(deeponet_forward(xb2, xt2, params2))
    assert out3.shape == (B2, Q2, 1), out3.shape
    assert jnp.allclose(out3, ref2, atol=5e-2, rtol=5e-2), "mismatch vs reference (bf16)"

    # TODO(synk): multi-hidden-layer MLPs / LayerNorm (ln=True) variants of DeepONet are
    # not covered by this fused kernel (default 1-hidden-layer ReLU, ln=False only).
    print("KERNEL_OK")
</pallas_src>

<mosaic_0001>
module attributes {stable_mosaic.version = 11 : i64} {
  func.func @_deeponet_kernel(%arg0: i32, %arg1: i32, %arg2: memref<1x8x128xf32, #tpu.memory_space<vmem>>, %arg3: memref<32x8xf32, #tpu.memory_space<vmem>>, %arg4: memref<32x1xf32, #tpu.memory_space<vmem>>, %arg5: memref<1x1x32xf32, #tpu.memory_space<vmem>>, %arg6: memref<1x1x1xf32, #tpu.memory_space<vmem>>, %arg7: memref<1x1x128xf32, #tpu.memory_space<vmem>>) attributes {dimension_semantics = [#tpu.dimension_semantics<parallel>, #tpu.dimension_semantics<parallel>], iteration_bounds = array<i64: 2, 1>, scalar_prefetch = 0 : i64, scratch_operands = 0 : i64, tpu.core_type = #tpu.core_type<tc>, window_params = [{transform_indices = @transform_0, window_bounds = array<i64: 1, 8, 128>}, {pipeline_mode = #tpu.pipeline_mode<synchronous>, transform_indices = @transform_1, window_bounds = array<i64: 32, 8>}, {pipeline_mode = #tpu.pipeline_mode<synchronous>, transform_indices = @transform_2, window_bounds = array<i64: 32, 1>}, {transform_indices = @transform_3, window_bounds = array<i64: 1, 1, 32>}, {transform_indices = @transform_4, window_bounds = array<i64: 1, 1, 1>}, {transform_indices = @transform_5, window_bounds = array<i64: 1, 1, 128>}]} {
    %c0 = arith.constant 0 : index
    %c0_0 = arith.constant 0 : index
    %c0_1 = arith.constant 0 : index
    %0 = vector.load %arg2[%c0, %c0_0, %c0_1] : memref<1x8x128xf32, #tpu.memory_space<vmem>>, vector<1x8x128xf32>
    %1 = vector.shape_cast %0 : vector<1x8x128xf32> to vector<8x128xf32>
    %c0_2 = arith.constant 0 : index
    %c0_3 = arith.constant 0 : index
    %2 = vector.load %arg3[%c0_2, %c0_3] : memref<32x8xf32, #tpu.memory_space<vmem>>, vector<32x8xf32>
    %cst = arith.constant dense<0.000000e+00> : vector<32x128xf32>
    %3 = tpu.matmul %2, %1, %cst {dimension_numbers = #tpu.dot_dimension_numbers<[1], [0], [0], [1], [0, 0, 1, 1], [], []>} : vector<32x8xf32>, vector<8x128xf32>, vector<32x128xf32> -> vector<32x128xf32>
    %c0_4 = arith.constant 0 : index
    %c0_5 = arith.constant 0 : index
    %4 = vector.load %arg4[%c0_4, %c0_5] : memref<32x1xf32, #tpu.memory_space<vmem>>, vector<32x1xf32>
    %5 = vector.broadcast %4 : vector<32x1xf32> to vector<32x128xf32>
    %6 = arith.addf %3, %5 : vector<32x128xf32>
    %cst_6 = arith.constant 0.000000e+00 : f32
    %7 = vector.broadcast %cst_6 : f32 to vector<32x128xf32>
    %8 = arith.maximumf %6, %7 : vector<32x128xf32>
    %c0_7 = arith.constant 0 : index
    %c0_8 = arith.constant 0 : index
    %c0_9 = arith.constant 0 : index
    %9 = vector.load %arg5[%c0_7, %c0_8, %c0_9] : memref<1x1x32xf32, #tpu.memory_space<vmem>>, vector<1x1x32xf32>
    %10 = vector.shape_cast %9 : vector<1x1x32xf32> to vector<1x32xf32>
    %cst_10 = arith.constant dense<0.000000e+00> : vector<1x128xf32>
    %11 = tpu.matmul %10, %8, %cst_10 {dimension_numbers = #tpu.dot_dimension_numbers<[1], [0], [0], [1], [0, 0, 1, 1], [], []>} : vector<1x32xf32>, vector<32x128xf32>, vector<1x128xf32> -> vector<1x128xf32>
    %c0_11 = arith.constant 0 : index
    %c0_12 = arith.constant 0 : index
    %c0_13 = arith.constant 0 : index
    %12 = vector.load %arg6[%c0_11, %c0_12, %c0_13] : memref<1x1x1xf32, #tpu.memory_space<vmem>>, vector<1x1x1xf32>
    %13 = vector.shape_cast %12 : vector<1x1x1xf32> to vector<1x1xf32>
    %14 = vector.broadcast %13 : vector<1x1xf32> to vector<1x128xf32>
    %15 = arith.addf %11, %14 : vector<1x128xf32>
    %16 = vector.shape_cast %15 : vector<1x128xf32> to vector<1x1x128xf32>
    %c0_14 = arith.constant 0 : index
    %c0_15 = arith.constant 0 : index
    %c0_16 = arith.constant 0 : index
    %17 = vector.load %arg7[%c0_14, %c0_15, %c0_16] : memref<1x1x128xf32, #tpu.memory_space<vmem>>, vector<1x1x128xf32>
    tpu.vector_store %arg7[%c0_14, %c0_15, %c0_16], %16 {strides = array<i32>} : memref<1x1x128xf32, #tpu.memory_space<vmem>>, vector<1x1x128xf32>,
    return
  }
  func.func @transform_0(%arg0: i32, %arg1: i32) -> (i32, i32, i32) {
    %c0_i32 = arith.constant 0 : i32
    %c0_i32_0 = arith.constant 0 : i32
    return %arg0, %c0_i32, %arg1 : i32, i32, i32
  }
  func.func @transform_1(%arg0: i32, %arg1: i32) -> (i32, i32) {
    %c0_i32 = arith.constant 0 : i32
    %c0_i32_0 = arith.constant 0 : i32
    %c0_i32_1 = arith.constant 0 : i32
    return %c0_i32, %c0_i32_0 : i32, i32
  }
  func.func @transform_2(%arg0: i32, %arg1: i32) -> (i32, i32) {
    %c0_i32 = arith.constant 0 : i32
    %c0_i32_0 = arith.constant 0 : i32
    %c0_i32_1 = arith.constant 0 : i32
    return %c0_i32, %c0_i32_0 : i32, i32
  }
  func.func @transform_3(%arg0: i32, %arg1: i32) -> (i32, i32, i32) {
    %c0_i32 = arith.constant 0 : i32
    %c0_i32_0 = arith.constant 0 : i32
    %c0_i32_1 = arith.constant 0 : i32
    return %arg0, %c0_i32, %c0_i32_0 : i32, i32, i32
  }
  func.func @transform_4(%arg0: i32, %arg1: i32) -> (i32, i32, i32) {
    %c0_i32 = arith.constant 0 : i32
    %c0_i32_0 = arith.constant 0 : i32
    %c0_i32_1 = arith.constant 0 : i32
    return %arg0, %c0_i32, %c0_i32_0 : i32, i32, i32
  }
  func.func @transform_5(%arg0: i32, %arg1: i32) -> (i32, i32, i32) {
    %c0_i32 = arith.constant 0 : i32
    %c0_i32_0 = arith.constant 0 : i32
    return %arg0, %c0_i32, %arg1 : i32, i32, i32
  }
}

</mosaic_0001>

<bundles_post_ra>
// kernel: tpu_custom_call.1
= control target key start
LH: loop header
LB: loop body
LE: loop exit
PB: predicated region body
PF: predicated region fallthrough
CT: control target
= control target key end

     0   :  { %10 = vsyncpa [#allocation3], 0  ;;  %s947_s0 = inlined_call_operand.vmem [shape: f32[2,8,128], index: 0, kind: input, shape index: {}]   ;;  %s948_s1 = inlined_call_operand.vmem [shape: f32[32,8], index: 1, kind: input, shape index: {}]   ;;  %s949_s2 = inlined_call_operand.vmem [shape: f32[32,1], index: 2, kind: input, shape index: {}]   ;;  %s950_s3 = inlined_call_operand.vmem [shape: f32[2,1,32], index: 3, kind: input, shape index: {}]   ;;  %s951_s4 = inlined_call_operand.vmem [shape: f32[2,1,1], index: 4, kind: input, shape index: {}]   ;;  %s952_s5 = inlined_call_operand.hbm [shape: f32[2,1,128], index: 5, kind: output, shape index: {}]  }
   0x1   :  { %12 = vsyncpa [#allocation3 + $0x1], 0  ;;  %s803_s18 = smov 0   ;;  %s805_s19 = smov 0  }
   0x2   :  { %s807_s20 = smov 0   ;;  %s809_s21 = smov 0  }
   0x3   :  { %s811_s22 = smov 0   ;;  %s813_s23 = smov 0  }
   0x4 LB: > { %s588_s24 = sadd.s32 4294967295, %s767_s23   ;;  %s589_s25 = sadd.s32 4294967294, %s767_s23   ;;  %s767_s23 = sphi %s813_s23, %s18_s23   ;;  %s763_s22 = sphi %s811_s22, %s959_s22   ;;  %s759_s21 = sphi %s809_s21, %s958_s21   ;;  %s755_s20 = sphi %s807_s20, %s957_s20   ;;  %s751_s19 = sphi %s805_s19, %s956_s19   ;;  %s747_s18 = sphi %s803_s18, %s955_s18  }
   0x5   : > { %s30_s26 = sadd.s32 1, %s763_s22  ;;  %s161_s27 = sadd.s32 1, %s755_s20 }
   0x6   : > { %p32_p0 = scmp.ge.s32.totalorder %s30_s26, 2  ;;  %p171_p1 = scmp.ne.s32.totalorder %s755_s20, %s751_s19 }
   0x7   : > { %p172_p2 = scmp.eq.s32.totalorder %s588_s24, 1  ;;  %p177_p3 = scmp.ne.s32.totalorder %s751_s19, %s747_s18 }
   0x8   : > { %s961_s26 = smov (%p32_p0, %s30_s26), 0  ;;  %p178_p5 = scmp.eq.s32.totalorder %s589_s25, 1 }
   0x9   : > { %p843_p4 = por %p172_p2, %p171_p1  ;;  %s156_s29 = ssub.s32 %s763_s22, %s961_s26 }
   0xa   : > { %p592_p6 = scmp.ge.s32.totalorder %s767_s23, 1  ;;  %p159_p7 = scmp.eq.s32.totalorder %s156_s29, 0 }
   0xb   : > { %p850_p8 = por %p178_p5, %p177_p3  ;;  %p224_p9 = scmp.lt.s32.totalorder %s767_s23, 3 }
   0xc   : > { %s856_s6 = scalar_select %p159_p7, %s755_s20, %s161_s27  }
   0xd   : > { %p225_p10 = pnand %p592_p6, %p224_p9 }
   0xe   : > { %p259_p11 = scmp.lt.s32.totalorder (!%p225_p10), %s759_s21, 1  ;;  %s257_s27 = sand.u32 (!%p225_p10), 1, %s751_s19  }
   0xf   : > { %228 = sbr.rel (%p225_p10) target bundleno = 443 (0x1bb), region = 40  ;;  %s258_s7 = scalar_lea.vmem (!%p225_p10), [#allocation2], %s257_s27 }
  0x10   : > { %s490_s12 = scalar_lea.sflag (!%p225_p10), [#allocation3], %s257_s27 }
  0x14   : > { %v273_v0 = vld [vmem:[%s948_s1] sm:$0xff]  ;;  %vm301_vm0 = vcmask 64512   ;;  %v769_v1 = vmov 0   ;;  %v280_v2 = vld [vmem:[%s949_s2 + $0x18] sm:$0xff]  ;;  %s867_s11 = scalar_select %p259_p11, %s759_s21, 1  ;;  %v278_v3 = vld [vmem:[%s949_s2 + $0x8] sm:$0xff]  ;;  %v410_v29 = vlaneseq }
  0x15   : > { %614 = vmatprep.mubr.msk.f32.mxu0 %vm301_vm0, %v273_v0  ;;  %689 = vset.pattern.permute.xlu0 %v769_v1  ;;  %v279_v4 = vld [vmem:[%s949_s2 + $0x10] sm:$0xff]  ;;  %v277_v5 = vld [vmem:[%s949_s2] sm:$0xff]  ;;  %v274_v7 = vld [vmem:[%s948_s1 + $0x8] sm:$0xff]  ;;  %v770_v11 = vmov 0.0   ;;  %vm771_vm1 = vmmov 0   ;;  %vm414_vm2 = vcmask 261120  }
  0x16   : > { %298 = vperm.xlu0 %689, %v280_v2   ;;  %690 = vset.pattern.permute.xlu1 %v769_v1  ;;  %s593_s16 = sshll.u32 %s867_s11, 3  ;;  %s271_s29 = scalar_lea.vmem %s951_s4, %s867_s11  ;;  %v275_v8 = vld [vmem:[%s948_s1 + $0x10] sm:$0xff]  ;;  %v276_v10 = vld [vmem:[%s948_s1 + $0x18] sm:$0xff]  ;;  %v411_v30 = vshrl.u32 %v410_v29, 7 }
  0x17   : > { %288 = vperm.xlu1 %690, %v278_v3   ;;  %s265_s9 = scalar_lea.vmem %s947_s0, %s593_s16  ;;  %v404_v9 = vld [vmem:[%s271_s29] sm:$0x1]  ;;  %620 = vmatprep.subr.mxu1 %v770_v11  ;;  %s268_s25 = scalar_lea.vmem %s950_s3, %s867_s11 }
  0x18   : > { %v272_v6 = vld [vmem:[%s265_s9] sm:$0xff]  ;;  %628 = vmatprep.mubr.msk.f32.mxu1 %vm771_vm1, %v770_v11  ;;  %v412_v31 = vsub.s32 0, %v411_v30  ;;  %s599_s29 = sshll.u32 %s759_s21, 4  ;;  %s503_s11 = sshll.u32 %s258_s7, 4  ;;  %s504_s11 = int_to_ptr.vmem [resolvable:$true] %s503_s11 }
  0x19   : > { %612 = vmatprep.subr.mxu0 %v272_v6  ;;  %v403_v28 = vld [vmem:[%s268_s25] sm:$0x1]  ;;  %s907_s10 = scalar_lea.hbm %s952_s5, %s599_s29  ;;  %s691_s13 = scalar_lea.vmem %s504_s11, 16 }
  0x1a   : > { %293 = vperm.xlu0 %689, %v279_v4   ;;  %613 = vmatpush3.msra.mxu0 %v272_v6  ;;  %p692_p12 = scmp.ne.s32.totalorder %s504_s11, %s691_s13  ;;  %s772_s21 = smov [#allocation2]  }
  0x1b   : > { %283 = vperm.xlu1 %690, %v277_v5   ;;  %615 = vmatmul.mubr.msk.f32.vlgmr.msra.gmra.mxu0 %vm301_vm0, %v274_v7  ;;  %s695_s14 = sshll.u32 %s772_s21, 4  ;;  %s696_s14 = int_to_ptr.vmem [resolvable:$false] %s695_s14 }
  0x1c   : > { %617 = vmatprep.mubr.msk.f32.mxu0 %vm301_vm0, %v275_v8  ;;  %p693_p13 = pnand %p692_p12, %p843_p4  ;;  %s697_s15 = scalar_lea.vmem %s696_s14, 32 }
  0x1d   : > { %p698_p1 = scmp.lt.s32.totalorder %s504_s11, %s696_s14  ;;  %p699_p2 = scmp.lt.s32.totalorder %s697_s15, %s691_s13 }
  0x1e   : > { %407 = vperm.xlu0 %689, %v404_v9   ;;  %p694_p0 = pneg %p693_p13 }
  0x1f   : > { %618 = vmatmul.mubr.msk.f32.gmra.mxu0 %vm301_vm0, %v276_v10  ;;  %p700_p3 = por %p699_p2, %p698_p1 }
  0x21   : > { %p701_p5 = pnand %p700_p3, %p694_p0 }
  0x91   : > { %v299_v12 = vpop.permute.xlu0 %298 }
  0x92   : > { %v289_v13 = vpop.permute.xlu1 %288 }
  0x95   : > { %v294_v17 = vpop.permute.xlu0 %293 }
  0x96   : > { %v284_v19 = vpop.permute.xlu1 %283 }
  0x99   : > { %v408_v32 = vpop.permute.xlu0 %407 }
  0x9a   : > { %v413_v33 = vrot.slane %v408_v32, %v412_v31 }
  0xdb   : > { %v616_v14 = vpop.f32.mrf.mxu0 }
  0xdc   : > { %v386_v21 = vadd.f32 %v616_v14, %v289_v13 }
  0xdd   : > { %v380_v15 = vpop.f32.mrf.mxu0 }
  0xde   : > { %v381_v24 = vadd.f32 %v380_v15, %v284_v19  ;;  %v400_v26 = vmax.f32 %v386_v21, 0.0 }
  0xdf   : > { %v619_v16 = vpop.f32.mrf.mxu0 }
  0xe0   : > { %v396_v18 = vadd.f32 %v619_v16, %v299_v12  ;;  %v399_v27 = vmax.f32 %v381_v24, 0.0 }
  0xe1   : > { %v390_v20 = vpop.f32.mrf.mxu0 }
  0xe2   : > { %v402_v22 = vmax.f32 %v396_v18, 0.0  ;;  %v391_v23 = vadd.f32 %v390_v20, %v294_v17 }
  0xe4   : > { %v401_v25 = vmax.f32 %v391_v23, 0.0  ;;  %621 = vmatpush3.msra.mxu1 %v402_v22 }
  0xe5   : > { %622 = vmatprep.subr.mxu1 %v770_v11 }
  0xe6   : > { %623 = vmatpush3.msra.mxu1 %v401_v25 }
  0xe7   : > { %624 = vmatprep.subr.mxu1 %v770_v11 }
  0xe8   : > { %625 = vmatpush3.msra.mxu1 %v400_v26 }
  0xe9   : > { %626 = vmatprep.subr.mxu1 %v770_v11 }
  0xea   : > { %627 = vmatpush3.msra.mxu1 %v399_v27 }
  0xeb   : > { %629 = vmatmul.mubr.msk.f32.vlgmr.msra.gmra.mxu1 %vm414_vm2, %v403_v28 }
 0x1ab   : > { %v484_v34 = vpop.f32.mrf.mxu1 }
 0x1ac   : > { %v485_v35 = vadd.f32 %v484_v34, %v413_v33 }
 0x1ad   : > { %v630_v36 = vpop.f32.mrf.mxu1 }
 0x1ae   : > { %488 = vst [vmem:[%s258_s7] sm:$0x1] %v485_v35 }
 0x1af   : > { %704 = shalt.err (!%p701_p5)
}
 0x1b0   : > { %s705_s16 = scalar_lea.hbm %s907_s10, 16  ;;  %s709_s25 = scalar_lea.hbm %s952_s5, 32 }
 0x1b1   : > { %p706_p6 = scmp.ne.s32.totalorder %s907_s10, %s705_s16  ;;  %p710_p10 = scmp.lt.s32.totalorder %s907_s10, %s952_s5 }
 0x1b2   : > { %p711_p11 = scmp.lt.s32.totalorder %s709_s25, %s705_s16 }
 0x1b3   : > { %p707_p7 = pnand %p706_p6, %p843_p4 }
 0x1b4   : > { %p712_p12 = por %p711_p11, %p710_p10 }
 0x1b5   : > { %p708_p9 = pneg %p707_p7 }
 0x1b7   : > { %p713_p13 = pnand %p712_p12, %p708_p9 }
 0x1b9   : > { %716 = shalt.err (!%p713_p13)
}
 0x1ba   : > { %631 = dma.vmem_to_hbm [thread:$0]  (%p843_p4), %s504_s11, 16, %s907_s10, %s490_s12  }
 0x1bb PF: > { %p637_p0 = scmp.ge.s32.totalorder %s767_s23, 2  ;;  %s515_s7 = sand.u32 1, %s747_s18  }
 0x1bc   : > { %s516_s8 = scalar_lea.sflag [#allocation3], %s515_s7 }
 0x1bd   : > { %p634_p1 = pnand %p637_p0, %p850_p8 }
 0x1bf   : > { %p635_p2 = pneg %p634_p1 }
 0x1c1   : > { %742 = dma.done.wait (%p635_p2), %s516_s8, 16  }
 0x1c2   : > { %744 = vsyncadd (%p635_p2), %s516_s8, 4294967280  ;;  %s18_s23 = sadd.s32 1, %s767_s23   ;;  %s955_s18 = smov %s751_s19 }
 0x1c3   : > { %p15_p3 = scmp.ge.s32.totalorder %s18_s23, 4   ;;  %s956_s19 = smov %s755_s20 }
 0x1c4   : > { %s957_s20 = smov %s856_s6  ;;  %s958_s21 = smov %s763_s22 }
 0x1c5   : > { %s959_s22 = smov %s961_s26  ;;  %17 = sbr.rel (!%p15_p3) target bundleno = 4 (0x4), region = 81 }
 0x1ca   :  { %520 = vsyncpa [#allocation3], 1 }
 0x1cb   :  { %522 = vsyncpa [#allocation3 + $0x1], 1 }

</bundles_post_ra>
